<compile_context>
chip_gen: v6e
topology: v6e:2x2x1
jax: 0.10.0
libtpu: 0.0.40
codegen_flags: <defaults>
</compile_context>

<pallas_src>
import jax
import jax.numpy as jnp
from jax.experimental import pallas as pl
from jax.experimental.pallas import tpu as pltpu


def _round_up(x, m):
    return ((x + m - 1) // m) * m


def critic_kernel(x_ref, w1_ref, b1_ref, w2_ref, b2_ref, w3_ref, b3_ref, q_ref):
    """One batch tile of the critic MLP.

    x_ref : (TB, S+A) f32      (concat done in the wrapper)
    w1    : (S+A, 256) bf16    b1 : (1, 256) f32
    w2    : (256, 256) bf16    b2 : (1, 256) f32
    w3    : (1, 256)   f32     b3 : (1, 1)   f32 (SMEM scalar)
    q_ref : (TB, 1)    f32
    """
    f32 = jnp.float32
    bf16 = jnp.bfloat16

    # Layer 1: single small-K MXU matmul, f32 accumulation, bias + ReLU, then
    # cast once to bf16 (only the bf16 copy of h1 is kept for layer 2).
    h1 = jnp.dot(x_ref[...].astype(bf16), w1_ref[...],
                 preferred_element_type=f32)
    h1 = jnp.maximum(h1 + b1_ref[...], 0.0).astype(bf16)

    # Layer 2: MXU, f32 accumulation, bias + ReLU; stays f32 (feeds the VPU).
    h2 = jnp.dot(h1, w2_ref[...], preferred_element_type=f32)
    h2 = jnp.maximum(h2 + b2_ref[...], 0.0)

    # Layer 3 (out_features=1): VPU multiply + lane reduction instead of an
    # M=1 MXU matmul; keeps f32 precision and leaves the MXU idle here.
    q = jnp.sum(h2 * w3_ref[...], axis=-1, keepdims=True)
    q_ref[...] = (q + b3_ref[0, 0]).astype(q_ref.dtype)


def critic_forward(state, action, params, *, tile_b_max=2048):
    """q = l3(relu(l2(relu(l1(cat([state, action], 1)))))) via one Pallas call."""
    w1, b1, w2, b2, w3, b3 = params
    B, S = state.shape
    A = action.shape[1]
    H = w2.shape[0]
    K = S + A

    # One-time layout prep (outside the kernel).
    w1b = w1.astype(jnp.bfloat16)
    w2b = w2.astype(jnp.bfloat16)
    w3r = w3.reshape(1, H).astype(jnp.float32)   # f32: consumed by the VPU
    b1f = b1.reshape(1, H).astype(jnp.float32)
    b2f = b2.reshape(1, H).astype(jnp.float32)
    b3s = b3.reshape(1, 1).astype(jnp.float32)

    # Fused concat once in the wrapper (same HBM traffic, one layer-1 matmul).
    x = jnp.concatenate([state.astype(jnp.float32),
                         action.astype(jnp.float32)], axis=1)

    # Batch tiling:
    #   * tiny batches (<=128 rows): single full-array tile (block == array).
    #   * otherwise: >= 2 lane-aligned tiles (so both v7x TCs are fed), sized to
    #     minimize padding waste instead of rounding B up to a fixed tile.
    tile_b_max = max(128, _round_up(tile_b_max, 128))
    b8 = _round_up(B, 8)
    if b8 <= 128:
        num_tiles = 1
        tile_b = b8
    else:
        b128 = _round_up(B, 128)
        num_tiles = max(pl.cdiv(b128, tile_b_max), 2)
        tile_b = _round_up(pl.cdiv(b128, num_tiles), 128)
    b_pad = num_tiles * tile_b
    if b_pad != B:
        x = jnp.pad(x, ((0, b_pad - B), (0, 0)))
    grid = (num_tiles,)

    flops = 2 * b_pad * (K * H + H * H + H)
    bytes_accessed = (4 * b_pad * K                 # x reads
                      + 2 * (K * H + H * H)         # bf16 weights
                      + 4 * (3 * H + 1)             # f32 biases + w3 row
                      + 4 * b_pad)                  # q writes

    out = pl.pallas_call(
        critic_kernel,
        out_shape=jax.ShapeDtypeStruct((b_pad, 1), jnp.float32),
        grid=grid,
        in_specs=[
            pl.BlockSpec((tile_b, K), lambda i: (i, 0)),        # x tile
            pl.BlockSpec((K, H), lambda i: (0, 0)),             # W1 (resident)
            pl.BlockSpec((1, H), lambda i: (0, 0)),             # b1 (resident)
            pl.BlockSpec((H, H), lambda i: (0, 0)),             # W2 (resident)
            pl.BlockSpec((1, H), lambda i: (0, 0)),             # b2 (resident)
            pl.BlockSpec((1, H), lambda i: (0, 0)),             # W3 row (resident)
            pl.BlockSpec(memory_space=pltpu.MemorySpace.SMEM),  # b3 scalar
        ],
        out_specs=pl.BlockSpec((tile_b, 1), lambda i: (i, 0)),
        compiler_params=pltpu.CompilerParams(
            dimension_semantics=("parallel",),
            vmem_limit_bytes=32 * 1024 * 1024),
        cost_estimate=pl.CostEstimate(
            flops=flops, transcendentals=0, bytes_accessed=bytes_accessed),
    )(x, w1b, b1f, w2b, b2f, w3r, b3s)

    # (b_pad, 1) -> (B, 1); padded rows (relu(b)-propagated garbage) sliced off.
    return out[:B]


def init_critic_params(key, state_dim, action_dim, hidden=256):
    """Deterministic init mimicking PyTorch nn.Linear default:
    U(-1/sqrt(fan_in), 1/sqrt(fan_in)) for both weight and bias."""
    def linear(key, fan_in, fan_out):
        kw, kb = jax.random.split(key)
        bound = 1.0 / jnp.sqrt(jnp.float32(fan_in))
        w = jax.random.uniform(kw, (fan_in, fan_out), jnp.float32, -bound, bound)
        b = jax.random.uniform(kb, (1, fan_out), jnp.float32, -bound, bound)
        return w, b

    k1, k2, k3 = jax.random.split(key, 3)
    w1, b1 = linear(k1, state_dim + action_dim, hidden)
    w2, b2 = linear(k2, hidden, hidden)
    w3, b3 = linear(k3, hidden, 1)
    return (w1, b1, w2, b2, w3, b3)


def critic_reference(state, action, params):
    """Pure-JAX f32 reference for correctness checking."""
    w1, b1, w2, b2, w3, b3 = params
    x = jnp.concatenate([state, action], axis=1)
    h1 = jnp.maximum(x @ w1 + b1, 0.0)
    h2 = jnp.maximum(h1 @ w2 + b2, 0.0)
    return h2 @ w3 + b3


if __name__ == "__main__":
    # Small shapes consistent with a typical TD3 critic (MuJoCo-ish dims).
    batch, state_dim, action_dim = 2, 17, 6

    key = jax.random.PRNGKey(0)
    k_params, k_state, k_action = jax.random.split(key, 3)

    params = init_critic_params(k_params, state_dim, action_dim)
    state = jax.random.normal(k_state, (batch, state_dim), jnp.float32)
    action = jax.random.normal(k_action, (batch, action_dim), jnp.float32)

    q = jax.block_until_ready(critic_forward(state, action, params))
    q_ref = jax.block_until_ready(critic_reference(state, action, params))
    assert q.shape == (batch, 1), q.shape
    # bf16 matmuls (layers 1/2) with f32 accumulation -> loosened tolerance.
    assert jnp.allclose(q, q_ref, atol=5e-2, rtol=5e-2), (q, q_ref)

    # Also exercise the multi-tile (gridded) path with batch padding:
    # B=640 -> 2 tiles of 384 rows (pad-waste-minimizing split).
    kb_s, kb_a = jax.random.split(jax.random.PRNGKey(1))
    big_b = 640
    state_b = jax.random.normal(kb_s, (big_b, state_dim), jnp.float32)
    action_b = jax.random.normal(kb_a, (big_b, action_dim), jnp.float32)
    q_b = jax.block_until_ready(critic_forward(state_b, action_b, params))
    q_b_ref = jax.block_until_ready(critic_reference(state_b, action_b, params))
    assert q_b.shape == (big_b, 1), q_b.shape
    assert jnp.allclose(q_b, q_b_ref, atol=5e-2, rtol=5e-2)

    print("KERNEL_OK")
</pallas_src>

<mosaic_0001>
module attributes {stable_mosaic.version = 11 : i64} {
  func.func @critic_kernel(%arg0: i32, %arg1: memref<8x23xf32, #tpu.memory_space<vmem>>, %arg2: memref<23x256xbf16, #tpu.memory_space<vmem>>, %arg3: memref<1x256xf32, #tpu.memory_space<vmem>>, %arg4: memref<256x256xbf16, #tpu.memory_space<vmem>>, %arg5: memref<1x256xf32, #tpu.memory_space<vmem>>, %arg6: memref<1x256xf32, #tpu.memory_space<vmem>>, %arg7: memref<1x1xf32, #tpu.memory_space<smem>>, %arg8: memref<8x1xf32, #tpu.memory_space<vmem>>) attributes {dimension_semantics = [#tpu.dimension_semantics<parallel>], iteration_bounds = array<i64: 1>, scalar_prefetch = 0 : i64, scratch_operands = 0 : i64, tpu.core_type = #tpu.core_type<tc>, window_params = [{transform_indices = @transform_0, window_bounds = array<i64: 8, 23>}, {pipeline_mode = #tpu.pipeline_mode<synchronous>, transform_indices = @transform_1, window_bounds = array<i64: 23, 256>}, {pipeline_mode = #tpu.pipeline_mode<synchronous>, transform_indices = @transform_2, window_bounds = array<i64: 1, 256>}, {pipeline_mode = #tpu.pipeline_mode<synchronous>, transform_indices = @transform_3, window_bounds = array<i64: 256, 256>}, {pipeline_mode = #tpu.pipeline_mode<synchronous>, transform_indices = @transform_4, window_bounds = array<i64: 1, 256>}, {pipeline_mode = #tpu.pipeline_mode<synchronous>, transform_indices = @transform_5, window_bounds = array<i64: 1, 256>}, {transform_indices = @transform_6, window_bounds = array<i64: 1, 1>}, {transform_indices = @transform_7, window_bounds = array<i64: 8, 1>}]} {
    %c0 = arith.constant 0 : index
    %c0_0 = arith.constant 0 : index
    %0 = vector.load %arg1[%c0, %c0_0] : memref<8x23xf32, #tpu.memory_space<vmem>>, vector<8x23xf32>
    %1 = arith.truncf %0 : vector<8x23xf32> to vector<8x23xbf16>
    %c0_1 = arith.constant 0 : index
    %c0_2 = arith.constant 0 : index
    %2 = vector.load %arg2[%c0_1, %c0_2] : memref<23x256xbf16, #tpu.memory_space<vmem>>, vector<23x256xbf16>
    %cst = arith.constant dense<0.000000e+00> : vector<8x256xf32>
    %3 = tpu.matmul %1, %2, %cst {dimension_numbers = #tpu.dot_dimension_numbers<[1], [0], [0], [1], [0, 0, 1, 1], [], []>} : vector<8x23xbf16>, vector<23x256xbf16>, vector<8x256xf32> -> vector<8x256xf32>
    %c0_3 = arith.constant 0 : index
    %c0_4 = arith.constant 0 : index
    %4 = vector.load %arg3[%c0_3, %c0_4] : memref<1x256xf32, #tpu.memory_space<vmem>>, vector<1x256xf32>
    %5 = vector.broadcast %4 : vector<1x256xf32> to vector<8x256xf32>
    %6 = arith.addf %3, %5 : vector<8x256xf32>
    %cst_5 = arith.constant 0.000000e+00 : f32
    %7 = vector.broadcast %cst_5 : f32 to vector<8x256xf32>
    %8 = arith.maximumf %6, %7 : vector<8x256xf32>
    %9 = arith.truncf %8 : vector<8x256xf32> to vector<8x256xbf16>
    %c0_6 = arith.constant 0 : index
    %c0_7 = arith.constant 0 : index
    %10 = vector.load %arg4[%c0_6, %c0_7] : memref<256x256xbf16, #tpu.memory_space<vmem>>, vector<256x256xbf16>
    %cst_8 = arith.constant dense<0.000000e+00> : vector<8x256xf32>
    %11 = tpu.matmul %9, %10, %cst_8 {dimension_numbers = #tpu.dot_dimension_numbers<[1], [0], [0], [1], [0, 0, 1, 1], [], []>} : vector<8x256xbf16>, vector<256x256xbf16>, vector<8x256xf32> -> vector<8x256xf32>
    %c0_9 = arith.constant 0 : index
    %c0_10 = arith.constant 0 : index
    %12 = vector.load %arg5[%c0_9, %c0_10] : memref<1x256xf32, #tpu.memory_space<vmem>>, vector<1x256xf32>
    %13 = vector.broadcast %12 : vector<1x256xf32> to vector<8x256xf32>
    %14 = arith.addf %11, %13 : vector<8x256xf32>
    %cst_11 = arith.constant 0.000000e+00 : f32
    %15 = vector.broadcast %cst_11 : f32 to vector<8x256xf32>
    %16 = arith.maximumf %14, %15 : vector<8x256xf32>
    %c0_12 = arith.constant 0 : index
    %c0_13 = arith.constant 0 : index
    %17 = vector.load %arg6[%c0_12, %c0_13] : memref<1x256xf32, #tpu.memory_space<vmem>>, vector<1x256xf32>
    %18 = vector.broadcast %17 : vector<1x256xf32> to vector<8x256xf32>
    %19 = arith.mulf %16, %18 : vector<8x256xf32>
    %cst_14 = arith.constant dense<0.000000e+00> : vector<8xf32>
    %20 = vector.multi_reduction <add>, %19, %cst_14 [1] : vector<8x256xf32> to vector<8xf32>
    %21 = vector.shape_cast %20 : vector<8xf32> to vector<8x1xf32>
    %c0_15 = arith.constant 0 : index
    %c0_16 = arith.constant 0 : index
    %22 = memref.load %arg7[%c0_15, %c0_16] : memref<1x1xf32, #tpu.memory_space<smem>>
    %23 = vector.broadcast %22 : f32 to vector<8x1xf32>
    %24 = arith.addf %21, %23 : vector<8x1xf32>
    %c0_17 = arith.constant 0 : index
    %c0_18 = arith.constant 0 : index
    %25 = vector.load %arg8[%c0_17, %c0_18] : memref<8x1xf32, #tpu.memory_space<vmem>>, vector<8x1xf32>
    tpu.vector_store %arg8[%c0_17, %c0_18], %24 {strides = array<i32>} : memref<8x1xf32, #tpu.memory_space<vmem>>, vector<8x1xf32>,
    return
  }
  func.func @transform_0(%arg0: i32) -> (i32, i32) {
    %c0_i32 = arith.constant 0 : i32
    %c0_i32_0 = arith.constant 0 : i32
    return %arg0, %c0_i32 : i32, i32
  }
  func.func @transform_1(%arg0: i32) -> (i32, i32) {
    %c0_i32 = arith.constant 0 : i32
    %c0_i32_0 = arith.constant 0 : i32
    %c0_i32_1 = arith.constant 0 : i32
    return %c0_i32, %c0_i32_0 : i32, i32
  }
  func.func @transform_2(%arg0: i32) -> (i32, i32) {
    %c0_i32 = arith.constant 0 : i32
    %c0_i32_0 = arith.constant 0 : i32
    %c0_i32_1 = arith.constant 0 : i32
    return %c0_i32, %c0_i32_0 : i32, i32
  }
  func.func @transform_3(%arg0: i32) -> (i32, i32) {
    %c0_i32 = arith.constant 0 : i32
    %c0_i32_0 = arith.constant 0 : i32
    %c0_i32_1 = arith.constant 0 : i32
    return %c0_i32, %c0_i32_0 : i32, i32
  }
  func.func @transform_4(%arg0: i32) -> (i32, i32) {
    %c0_i32 = arith.constant 0 : i32
    %c0_i32_0 = arith.constant 0 : i32
    %c0_i32_1 = arith.constant 0 : i32
    return %c0_i32, %c0_i32_0 : i32, i32
  }
  func.func @transform_5(%arg0: i32) -> (i32, i32) {
    %c0_i32 = arith.constant 0 : i32
    %c0_i32_0 = arith.constant 0 : i32
    %c0_i32_1 = arith.constant 0 : i32
    return %c0_i32, %c0_i32_0 : i32, i32
  }
  func.func @transform_6(%arg0: i32) -> (i32, i32) {
    %c0_i32 = arith.constant 0 : i32
    %c0_i32_0 = arith.constant 0 : i32
    %c0_i32_1 = arith.constant 0 : i32
    return %c0_i32, %c0_i32_0 : i32, i32
  }
  func.func @transform_7(%arg0: i32) -> (i32, i32) {
    %c0_i32 = arith.constant 0 : i32
    %c0_i32_0 = arith.constant 0 : i32
    return %arg0, %c0_i32 : i32, i32
  }
}

</mosaic_0001>

<bundles_post_ra>
// kernel: tpu_custom_call.1
= control target key start
LH: loop header
LB: loop body
LE: loop exit
PB: predicated region body
PF: predicated region fallthrough
CT: control target
= control target key end

     0   :  { %13 = vsyncpa [#allocation4], 0  ;;  %s665_s0 = inlined_call_operand.hbm [shape: f32[8,23], index: 0, kind: input, shape index: {}]   ;;  %s666_s1 = inlined_call_operand.hbm [shape: bf16[23,256], index: 1, kind: input, shape index: {}]   ;;  %s667_s2 = inlined_call_operand.vmem [shape: f32[1,256], index: 2, kind: input, shape index: {}]   ;;  %s668_s3 = inlined_call_operand.hbm [shape: bf16[256,256], index: 3, kind: input, shape index: {}]   ;;  %s669_s4 = inlined_call_operand.vmem [shape: f32[1,256], index: 4, kind: input, shape index: {}]   ;;  %s670_s5 = inlined_call_operand.vmem [shape: f32[1,256], index: 5, kind: input, shape index: {}]   ;;  %s671_s6 = inlined_call_operand.<no memory space> [shape: f32[1,1], index: 6, kind: input, shape index: {}]   ;;  %s672_s7 = inlined_call_operand.vmem [shape: f32[8,1], index: 7, kind: output, shape index: {}]  }
   0x1   :  { %14 = vsyncpa [#allocation6], 0  ;;  %s594_s24 = smov [#allocation5]  }
   0x2   :  { %s30_s25 = sshll.u32 %s594_s24, 4  ;;  %s31_s25 = int_to_ptr.vmem [resolvable:$true] %s30_s25 }
   0x3   :  { %s538_s26 = scalar_lea.vmem %s31_s25, 384  ;;  %p543_p1 = scmp.lt.s32.totalorder %s31_s25, %s31_s25 }
   0x4   :  { %p539_p0 = scmp.ne.s32.totalorder %s31_s25, %s538_s26  ;;  %p544_p2 = scmp.lt.s32.totalorder %s538_s26, %s538_s26 }
   0x6   :  { %p545_p3 = por %p544_p2, %p543_p1 }
   0x8   :  { %p546_p4 = pnand %p545_p3, %p539_p0 }
   0xa   :  { %549 = shalt.err (!%p546_p4)
}
   0xb   :  { %s595_s27 = smov 128   ;;  %s596_s28 = smov 8  }
   0xc   :  { %36 = dma.hbm_to_vmem [thread:$0]  %s666_s1, 384, %s31_s25, [#allocation6], %s595_s27, %s595_s27, %s596_s28  }
   0xd   :  { %s597_s8 = smov [#allocation3]   ;;  %s598_s10 = smov [#allocation7]  }
   0xe   :  { %s21_s9 = sshll.u32 %s597_s8, 4  ;;  %s44_s11 = sshll.u32 %s598_s10, 4  ;;  %s22_s9 = int_to_ptr.vmem [resolvable:$true] %s21_s9  ;;  %s45_s11 = int_to_ptr.vmem [resolvable:$true] %s44_s11 }
   0xf   :  { %s558_s12 = scalar_lea.vmem %s22_s9, 128  ;;  %p563_p6 = scmp.lt.s32.totalorder %s22_s9, %s22_s9 }
  0x10   :  { %p559_p5 = scmp.ne.s32.totalorder %s22_s9, %s558_s12  ;;  %p564_p7 = scmp.lt.s32.totalorder %s558_s12, %s558_s12 }
  0x12   :  { %p565_p8 = por %p564_p7, %p563_p6 }
  0x14   :  { %p566_p9 = pnand %p565_p8, %p559_p5 }
  0x16   :  { %569 = shalt.err (!%p566_p9)
}
  0x17   :  { %24 = dma.hbm_to_vmem [thread:$0]  %s665_s0, 128, %s22_s9, [#allocation4]  }
  0x18   :  { %s578_s15 = scalar_lea.vmem %s45_s11, 4096  ;;  %p583_p11 = scmp.lt.s32.totalorder %s45_s11, %s45_s11 }
  0x19   :  { %p579_p10 = scmp.ne.s32.totalorder %s45_s11, %s578_s15  ;;  %p584_p12 = scmp.lt.s32.totalorder %s578_s15, %s578_s15 }
  0x1b   :  { %p585_p13 = por %p584_p12, %p583_p11 }
  0x1d   :  { %p586_p0 = pnand %p585_p13, %p579_p10 }
  0x1f   :  { %589 = shalt.err (!%p586_p0)
}
  0x20   :  { %50 = dma.hbm_to_vmem [thread:$0]  %s668_s3, 4096, %s45_s11, [#allocation6], %s595_s27, %s595_s27, %s596_s28  }
  0x21   :  { %590 = dma.done.wait [#allocation4], 128  }
  0x22   :  { %591 = vsyncadd [#allocation4], 4294967168 }
  0x23   :  { %592 = dma.done.wait [#allocation6], 4480  }
  0x24   :  { %593 = vsyncadd [#allocation6], 4294962816  ;;  %vm103_vm0 = vcmask 1042432   ;;  %v599_v0 = vmov 0   ;;  %vm104_vm1 = vcmask 1043456   ;;  %v600_v1 = vmov 65535  }
  0x25   :  { %145 = vmatprep.mubr.bf16.mxu0 %v599_v0  ;;  %v105_v2 = vsel %vm103_vm0, 4294967295, %v600_v1  ;;  %v71_v3 = vld [vmem:[#allocation5 + $0x10] sm:$0xff]  ;;  %v479_v7 = vld [vmem:[#allocation5 + $0x4] ss:$8 sps:$4 sm:$0xff]   ;;  %v481_v12 = vld [vmem:[#allocation5] ss:$8 sps:$4 sm:$0xff]   ;;  %v74_v45 = vlaneseq }
  0x26   :  { %v106_v4 = vsel %vm104_vm1, %v105_v2, 0  ;;  %v436_v5 = vcombine.high %v71_v3, %v71_v3  ;;  %v435_v6 = vcombine.low %v71_v3, %v71_v3  ;;  %v482_v8 = vld [vmem:[#allocation7 + $0x74] ss:$8 sps:$4 sm:$0xff]   ;;  %v484_v11 = vld [vmem:[#allocation7 + $0x70] ss:$8 sps:$4 sm:$0xff]   ;;  %v67_v14 = vld [vmem:[#allocation3] sm:$0xff] }
  0x27   :  { %362 = vmatprep.subr.bf16.mxu1 %v482_v8  ;;  %v485_v13 = vld [vmem:[#allocation7 + $0x64] ss:$8 sps:$4 sm:$0xff]   ;;  %v487_v15 = vld [vmem:[#allocation7 + $0x60] ss:$8 sps:$4 sm:$0xff]   ;;  %v488_v16 = vld [vmem:[#allocation7 + $0x54] ss:$8 sps:$4 sm:$0xff]   ;;  %v68_v17 = vpack.c.bf16 %v67_v14, %v67_v14 }
  0x28   :  { %v111_v9 = vand.u32 %v436_v5, %v106_v4  ;;  %v108_v10 = vand.u32 %v435_v6, %v106_v4  ;;  %363 = vmatpush1.bf16.msra.mxu1 %v484_v11  ;;  %v490_v18 = vld [vmem:[#allocation7 + $0x50] ss:$8 sps:$4 sm:$0xff]   ;;  %vm99_vm2 = vcmask 187392   ;;  %v491_v19 = vld [vmem:[#allocation7 + $0x44] ss:$8 sps:$4 sm:$0xff]   ;;  %v75_v46 = vshrl.u32 %v74_v45, 7 }
  0x29   :  { %364 = vmatprep.subr.bf16.mxu1 %v485_v13  ;;  %v493_v20 = vld [vmem:[#allocation7 + $0x40] ss:$8 sps:$4 sm:$0xff]   ;;  %v494_v21 = vld [vmem:[#allocation7 + $0x34] ss:$8 sps:$4 sm:$0xff]   ;;  %v496_v22 = vld [vmem:[#allocation7 + $0x30] ss:$8 sps:$4 sm:$0xff]  }
  0x2a   :  { %125 = vmatprep.subr.bf16.mxu0 %v111_v9  ;;  %v497_v23 = vld [vmem:[#allocation7 + $0x24] ss:$8 sps:$4 sm:$0xff]   ;;  %v499_v24 = vld [vmem:[#allocation7 + $0x20] ss:$8 sps:$4 sm:$0xff]   ;;  %v500_v25 = vld [vmem:[#allocation7 + $0x14] ss:$8 sps:$4 sm:$0xff]  }
  0x2b   :  { %126 = vmatpush1.bf16.msra.mxu0 %v108_v10  ;;  %v502_v26 = vld [vmem:[#allocation7 + $0x10] ss:$8 sps:$4 sm:$0xff]   ;;  %v503_v27 = vld [vmem:[#allocation7 + $0x4] ss:$8 sps:$4 sm:$0xff]   ;;  %v505_v28 = vld [vmem:[#allocation7] ss:$8 sps:$4 sm:$0xff]  }
  0x2c   :  { %127 = vmatprep.subr.bf16.mxu0 %v479_v7  ;;  %365 = vmatpush1.bf16.msra.mxu1 %v487_v15  ;;  %v506_v29 = vld [vmem:[#allocation7 + $0xf4] ss:$8 sps:$4 sm:$0xff]   ;;  %v508_v30 = vld [vmem:[#allocation7 + $0xf0] ss:$8 sps:$4 sm:$0xff]   ;;  %v509_v31 = vld [vmem:[#allocation7 + $0xe4] ss:$8 sps:$4 sm:$0xff]   ;;  %v423_v15 = vstv %s671_s6 }
  0x2d   :  { %366 = vmatprep.subr.bf16.mxu1 %v488_v16  ;;  %v511_v32 = vld [vmem:[#allocation7 + $0xe0] ss:$8 sps:$4 sm:$0xff]   ;;  %v512_v33 = vld [vmem:[#allocation7 + $0xd4] ss:$8 sps:$4 sm:$0xff]   ;;  %v514_v34 = vld [vmem:[#allocation7 + $0xd0] ss:$8 sps:$4 sm:$0xff]  }
  0x2e   :  { %v515_v35 = vld [vmem:[#allocation7 + $0xc4] ss:$8 sps:$4 sm:$0xff]   ;;  %v517_v36 = vld [vmem:[#allocation7 + $0xc0] ss:$8 sps:$4 sm:$0xff]   ;;  %v518_v37 = vld [vmem:[#allocation7 + $0xb4] ss:$8 sps:$4 sm:$0xff]  }
  0x2f   :  { %128 = vmatpush1.bf16.msra.mxu0 %v481_v12  ;;  %v520_v38 = vld [vmem:[#allocation7 + $0xb0] ss:$8 sps:$4 sm:$0xff]   ;;  %v521_v39 = vld [vmem:[#allocation7 + $0xa4] ss:$8 sps:$4 sm:$0xff]   ;;  %v523_v40 = vld [vmem:[#allocation7 + $0xa0] ss:$8 sps:$4 sm:$0xff]  }
  0x30   :  { %367 = vmatpush1.bf16.msra.mxu1 %v490_v18  ;;  %v524_v41 = vld [vmem:[#allocation7 + $0x94] ss:$8 sps:$4 sm:$0xff]   ;;  %v526_v42 = vld [vmem:[#allocation7 + $0x90] ss:$8 sps:$4 sm:$0xff]   ;;  %v527_v43 = vld [vmem:[#allocation7 + $0x84] ss:$8 sps:$4 sm:$0xff]  }
  0x31   :  { %368 = vmatprep.subr.bf16.mxu1 %v491_v19  ;;  %v529_v44 = vld [vmem:[#allocation7 + $0x80] ss:$8 sps:$4 sm:$0xff]   ;;  %v76_v47 = vsub.s32 0, %v75_v46  ;;  %v80_v49 = vsub.s32 1, %v75_v46  ;;  %vm425_vm3 = vcmask 7168  }
  0x32   :  { %437 = vmatmul.mubr.msk.bf16.vlgmr.msra.gmra.mxu0 %vm99_vm2, %v68_v17  ;;  %v72_v48 = vld [vmem:[%s667_s2] sm:$0x3] }
  0x33   :  { %v77_v50 = vrot.slane %v72_v48, %v76_v47  ;;  %v81_v51 = vrot.slane %v72_v48, %v80_v49  ;;  %v190_v62 = vld [vmem:[%s669_s4] sm:$0x3] }
  0x34   :  { %369 = vmatpush1.bf16.msra.mxu1 %v493_v20  ;;  %v195_v63 = vrot.slane %v190_v62, %v76_v47  ;;  %v199_v0 = vrot.slane %v190_v62, %v80_v49  ;;  %v405_v2 = vld [vmem:[%s670_s5] sm:$0x3] }
  0x35   :  { %370 = vmatprep.subr.bf16.mxu1 %v494_v21  ;;  %v410_v7 = vrot.slane %v405_v2, %v76_v47  ;;  %v414_v8 = vrot.slane %v405_v2, %v80_v49 }
  0x38   :  { %371 = vmatpush1.bf16.msra.mxu1 %v496_v22 }
  0x39   :  { %372 = vmatprep.subr.bf16.mxu1 %v497_v23 }
  0x3c   :  { %373 = vmatpush1.bf16.msra.mxu1 %v499_v24 }
  0x3d   :  { %374 = vmatprep.subr.bf16.mxu1 %v500_v25 }
  0x40   :  { %375 = vmatpush1.bf16.msra.mxu1 %v502_v26 }
  0x41   :  { %376 = vmatprep.subr.bf16.mxu1 %v503_v27 }
  0x44   :  { %377 = vmatpush1.bf16.msra.mxu1 %v505_v28 }
  0x45   :  { %378 = vmatprep.subr.bf16.mxu1 %v506_v29 }
  0x48   :  { %379 = vmatpush2.bf16.msra.mxu1 %v508_v30 }
  0x49   :  { %380 = vmatprep.subr.bf16.mxu1 %v509_v31 }
  0x4c   :  { %381 = vmatpush2.bf16.msra.mxu1 %v511_v32 }
  0x4d   :  { %382 = vmatprep.subr.bf16.mxu1 %v512_v33 }
  0x50   :  { %383 = vmatpush2.bf16.msra.mxu1 %v514_v34 }
  0x51   :  { %384 = vmatprep.subr.bf16.mxu1 %v515_v35 }
  0x54   :  { %385 = vmatpush2.bf16.msra.mxu1 %v517_v36 }
  0x55   :  { %386 = vmatprep.subr.bf16.mxu1 %v518_v37 }
  0x58   :  { %387 = vmatpush2.bf16.msra.mxu1 %v520_v38 }
  0x59   :  { %388 = vmatprep.subr.bf16.mxu1 %v521_v39 }
  0x5c   :  { %389 = vmatpush2.bf16.msra.mxu1 %v523_v40 }
  0x5d   :  { %390 = vmatprep.subr.bf16.mxu1 %v524_v41 }
  0x60   :  { %391 = vmatpush2.bf16.msra.mxu1 %v526_v42 }
  0x61   :  { %392 = vmatprep.subr.bf16.mxu1 %v527_v43 }
  0x64   :  { %393 = vmatpush2.bf16.msra.mxu1 %v529_v44 }
  0xf2   :  { %v147_v52 = vpop.f32.mrf.mxu0 }
  0xf3   :  { %v148_v53 = vadd.f32 %v147_v52, %v77_v50 }
  0xf4   :  { %v149_v54 = vpop.f32.mrf.mxu0 }
  0xf5   :  { %v150_v55 = vadd.f32 %v149_v54, %v81_v51  ;;  %v154_v56 = vmax.f32 %v148_v53, 0.0 }
  0xf6   :  { %v151_v57 = vpop.f32.mrf.mxu0 }
  0xf7   :  { %v155_v58 = vmax.f32 %v150_v55, 0.0  ;;  %v156_v61 = vpack.c.bf16 %v154_v56, %v154_v56 }
  0xf8   :  { %v152_v59 = vpop.f32.mrf.mxu0 }
  0xf9   :  { %v157_v60 = vpack.c.bf16 %v155_v58, %v155_v58 }
  0xfb   :  { %394 = vmatprep.mubr.bf16.mxu1 %v157_v60 }
  0xfc   :  { %395 = vmatmul.mubr.bf16.vlgmr.msra.gmra.mxu1 %v156_v61 }
 0x1bc   :  { %v396_v1 = vpop.f32.mrf.mxu1 }
 0x1bd   :  { %v397_v3 = vadd.f32 %v396_v1, %v195_v63 }
 0x1be   :  { %v398_v4 = vpop.f32.mrf.mxu1 }
 0x1bf   :  { %v403_v5 = vmax.f32 %v397_v3, 0.0  ;;  %v399_v6 = vadd.f32 %v398_v4, %v199_v0 }
 0x1c0   :  { %v400_v9 = vpop.f32.mrf.mxu1 }
 0x1c1   :  { %v404_v10 = vmax.f32 %v399_v6, 0.0  ;;  %v417_v12 = vmul.f32 %v410_v7, %v403_v5 }
 0x1c2   :  { %v401_v11 = vpop.f32.mrf.mxu1 }
 0x1c3   :  { %v418_v13 = vmul.f32 %v414_v8, %v404_v10 }
 0x1c5   :  { %v419_v14 = vadd.f32 %v418_v13, %v417_v12 }
 0x1c7   :  { %420 = vadd.xlane.f32.xlu0 %v419_v14 }
 0x250   :  { %v421_v16 = vpop.xlane.xlu0 %420 }
 0x251   :  { %v424_v17 = vadd.f32 %v423_v15, %v421_v16 }
 0x253   :  { %426 = vst.msk [vmem:[%s672_s7] sm:$0xff] %vm425_vm3, %v424_v17 }
 0x254   :  { %431 = vsyncpa [#allocation4], 1 }
 0x255   :  { %432 = vsyncpa [#allocation6], 1 }

</bundles_post_ra>
